<compile_context>
chip_gen: v6e
topology: v6e:2x2x1
jax: 0.10.0
libtpu: 0.0.40
codegen_flags: <defaults>
</compile_context>

<pallas_src>
import jax
import jax.numpy as jnp
from jax import lax
from jax.experimental import pallas as pl
from jax.experimental.pallas import tpu as pltpu


def _mlp_kernel(x_ref, w1_ref, b1_ref, w2_ref, b2_ref, o_ref):
    # x_ref : (F, TT)   f32  -- one batch, all features, a tile of frames
    # w1_ref: (F, 512)  bf16 (resident across the grid)
    # b1_ref: (1, 512)  f32
    # w2_ref: (512, L)  bf16 (resident)
    # b2_ref: (1, L)    f32
    # o_ref : (TT, L)   f32
    x = x_ref[...].astype(jnp.bfloat16)  # cast in-register; no extra HBM pass
    # Contract the feature (sublane) axis directly: h[t, j] = sum_f x[f, t] * w1[f, j]
    h = lax.dot_general(
        x, w1_ref[...],
        dimension_numbers=(((0,), (0,)), ((), ())),
        preferred_element_type=jnp.float32,
    )                                                   # (TT, 512), f32 acc
    h = jnp.maximum(h + b1_ref[...], 0.0)               # bias + ReLU in f32
    out = jnp.dot(h.astype(jnp.bfloat16), w2_ref[...],
                  preferred_element_type=jnp.float32) + b2_ref[...]
    o_ref[...] = out.astype(o_ref.dtype)


def object_encoder_bps(x, w1, b1, w2, b2, *, max_frame_tile=256):
    """ObjectEncoder(data_rep='bps') forward.

    x : (bs, njoints, nfeats, nframes) float32
    w1: (input_feats, 512), b1: (512,)
    w2: (512, latent_dim),  b2: (latent_dim,)
    returns (nframes, bs, latent_dim) float32
    """
    bs, njoints, nfeats, nframes = x.shape
    input_feats = njoints * nfeats
    hidden = w1.shape[1]
    latent_dim = w2.shape[1]

    # Free row-major reshape (no HBM transpose of the big input).
    x3 = x.reshape(bs, input_feats, nframes)

    # Frame-tile size: the frame axis is the lane dim of the x block, so it
    # must be a multiple of 128 or equal to the full frame count.
    if nframes >= 128:
        tt = 128 * min(max_frame_tile // 128, nframes // 128)
    else:
        tt = nframes
    grid = (bs, pl.cdiv(nframes, tt))

    # Weights: cast once to bf16 (MXU-native). Biases stay f32.
    w1b = w1.astype(jnp.bfloat16)
    w2b = w2.astype(jnp.bfloat16)
    b1_2d = b1.reshape(1, hidden).astype(jnp.float32)
    b2_2d = b2.reshape(1, latent_dim).astype(jnp.float32)

    flops = 2 * bs * nframes * (input_feats * hidden + hidden * latent_dim)
    bytes_accessed = (
        x3.size * x3.dtype.itemsize        # x read
        + w1b.size * 2 + w2b.size * 2      # bf16 weights
        + b1_2d.size * 4 + b2_2d.size * 4  # biases
        + bs * nframes * latent_dim * 4    # output write
    )

    out = pl.pallas_call(
        _mlp_kernel,
        out_shape=jax.ShapeDtypeStruct((bs, nframes, latent_dim), jnp.float32),
        grid=grid,
        in_specs=[
            # x tile: one batch (squeezed), all features, a tile of frames.
            pl.BlockSpec((None, input_feats, tt), lambda b, t: (b, 0, t)),
            # Weights / biases: constant-index full blocks -> resident in VMEM.
            pl.BlockSpec((input_feats, hidden), lambda b, t: (0, 0)),
            pl.BlockSpec((1, hidden), lambda b, t: (0, 0)),
            pl.BlockSpec((hidden, latent_dim), lambda b, t: (0, 0)),
            pl.BlockSpec((1, latent_dim), lambda b, t: (0, 0)),
        ],
        out_specs=pl.BlockSpec((None, tt, latent_dim), lambda b, t: (b, t, 0)),
        compiler_params=pltpu.CompilerParams(
            # All tiles independent (no carried accumulator) -> parallel axes;
            # lets v7x shard across its two TensorCores.
            dimension_semantics=("parallel", "parallel"),
        ),
        cost_estimate=pl.CostEstimate(
            flops=flops, transcendentals=0, bytes_accessed=bytes_accessed),
    )(x3, w1b, b1_2d, w2b, b2_2d)

    # Only the small (bs, nframes, latent_dim) result gets transposed.
    return jnp.transpose(out, (1, 0, 2))


def _reference(x, w1, b1, w2, b2):
    bs, njoints, nfeats, nframes = x.shape
    x2d = jnp.transpose(x, (3, 0, 1, 2)).reshape(nframes, bs, njoints * nfeats)
    h = jnp.maximum(x2d @ w1 + b1, 0.0)
    return h @ w2 + b2


if __name__ == "__main__":
    # small shapes consistent with the module ('bps' branch)
    bs, njoints, nfeats, nframes = 2, 4, 8, 8
    input_feats = njoints * nfeats   # 32
    hidden = 512                     # fixed by nn.Sequential in __init__
    latent_dim = 32

    key = jax.random.PRNGKey(0)
    kx, k1, k2, k3, k4 = jax.random.split(key, 5)

    x = jax.random.normal(kx, (bs, njoints, nfeats, nframes), dtype=jnp.float32)
    # deterministic "Linear" params (synthetic init, not a checkpoint load)
    w1 = jax.random.normal(k1, (input_feats, hidden), dtype=jnp.float32) * 0.05
    b1 = jax.random.normal(k2, (hidden,), dtype=jnp.float32) * 0.05
    w2 = jax.random.normal(k3, (hidden, latent_dim), dtype=jnp.float32) * 0.05
    b2 = jax.random.normal(k4, (latent_dim,), dtype=jnp.float32) * 0.05

    out = object_encoder_bps(x, w1, b1, w2, b2)
    out = jax.block_until_ready(out)

    ref = _reference(x, w1, b1, w2, b2)
    assert out.shape == (nframes, bs, latent_dim), out.shape
    # bf16 matmul operands (f32 accumulation) -> loosened tolerance vs f32 ref
    assert jnp.allclose(out, ref, atol=2e-2, rtol=2e-2), float(
        jnp.max(jnp.abs(out - ref))
    )
    print("KERNEL_OK")
</pallas_src>

<mosaic_0001>
module attributes {stable_mosaic.version = 11 : i64} {
  func.func @_mlp_kernel(%arg0: i32, %arg1: i32, %arg2: memref<1x32x8xf32, #tpu.memory_space<vmem>>, %arg3: memref<32x512xbf16, #tpu.memory_space<vmem>>, %arg4: memref<1x512xf32, #tpu.memory_space<vmem>>, %arg5: memref<512x32xbf16, #tpu.memory_space<vmem>>, %arg6: memref<1x32xf32, #tpu.memory_space<vmem>>, %arg7: memref<1x8x32xf32, #tpu.memory_space<vmem>>) attributes {dimension_semantics = [#tpu.dimension_semantics<parallel>, #tpu.dimension_semantics<parallel>], iteration_bounds = array<i64: 2, 1>, scalar_prefetch = 0 : i64, scratch_operands = 0 : i64, tpu.core_type = #tpu.core_type<tc>, window_params = [{transform_indices = @transform_0, window_bounds = array<i64: 1, 32, 8>}, {pipeline_mode = #tpu.pipeline_mode<synchronous>, transform_indices = @transform_1, window_bounds = array<i64: 32, 512>}, {pipeline_mode = #tpu.pipeline_mode<synchronous>, transform_indices = @transform_2, window_bounds = array<i64: 1, 512>}, {pipeline_mode = #tpu.pipeline_mode<synchronous>, transform_indices = @transform_3, window_bounds = array<i64: 512, 32>}, {pipeline_mode = #tpu.pipeline_mode<synchronous>, transform_indices = @transform_4, window_bounds = array<i64: 1, 32>}, {transform_indices = @transform_5, window_bounds = array<i64: 1, 8, 32>}]} {
    %c0 = arith.constant 0 : index
    %c0_0 = arith.constant 0 : index
    %c0_1 = arith.constant 0 : index
    %0 = vector.load %arg2[%c0, %c0_0, %c0_1] : memref<1x32x8xf32, #tpu.memory_space<vmem>>, vector<1x32x8xf32>
    %1 = vector.shape_cast %0 : vector<1x32x8xf32> to vector<32x8xf32>
    %2 = arith.truncf %1 : vector<32x8xf32> to vector<32x8xbf16>
    %c0_2 = arith.constant 0 : index
    %c0_3 = arith.constant 0 : index
    %3 = vector.load %arg3[%c0_2, %c0_3] : memref<32x512xbf16, #tpu.memory_space<vmem>>, vector<32x512xbf16>
    %cst = arith.constant dense<0.000000e+00> : vector<8x512xf32>
    %4 = tpu.matmul %2, %3, %cst {dimension_numbers = #tpu.dot_dimension_numbers<[0], [0], [1], [1], [0, 1, 1, 1], [], []>} : vector<32x8xbf16>, vector<32x512xbf16>, vector<8x512xf32> -> vector<8x512xf32>
    %c0_4 = arith.constant 0 : index
    %c0_5 = arith.constant 0 : index
    %5 = vector.load %arg4[%c0_4, %c0_5] : memref<1x512xf32, #tpu.memory_space<vmem>>, vector<1x512xf32>
    %6 = vector.broadcast %5 : vector<1x512xf32> to vector<8x512xf32>
    %7 = arith.addf %4, %6 : vector<8x512xf32>
    %cst_6 = arith.constant 0.000000e+00 : f32
    %8 = vector.broadcast %cst_6 : f32 to vector<8x512xf32>
    %9 = arith.maximumf %7, %8 : vector<8x512xf32>
    %10 = arith.truncf %9 : vector<8x512xf32> to vector<8x512xbf16>
    %c0_7 = arith.constant 0 : index
    %c0_8 = arith.constant 0 : index
    %11 = vector.load %arg5[%c0_7, %c0_8] : memref<512x32xbf16, #tpu.memory_space<vmem>>, vector<512x32xbf16>
    %cst_9 = arith.constant dense<0.000000e+00> : vector<8x32xf32>
    %12 = tpu.matmul %10, %11, %cst_9 {dimension_numbers = #tpu.dot_dimension_numbers<[1], [0], [0], [1], [0, 0, 1, 1], [], []>} : vector<8x512xbf16>, vector<512x32xbf16>, vector<8x32xf32> -> vector<8x32xf32>
    %c0_10 = arith.constant 0 : index
    %c0_11 = arith.constant 0 : index
    %13 = vector.load %arg6[%c0_10, %c0_11] : memref<1x32xf32, #tpu.memory_space<vmem>>, vector<1x32xf32>
    %14 = vector.broadcast %13 : vector<1x32xf32> to vector<8x32xf32>
    %15 = arith.addf %12, %14 : vector<8x32xf32>
    %c0_12 = arith.constant 0 : index
    %c0_13 = arith.constant 0 : index
    %c0_14 = arith.constant 0 : index
    %16 = vector.load %arg7[%c0_12, %c0_13, %c0_14] : memref<1x8x32xf32, #tpu.memory_space<vmem>>, vector<1x8x32xf32>
    %17 = vector.shape_cast %16 : vector<1x8x32xf32> to vector<8x32xf32>
    %18 = vector.shape_cast %15 : vector<8x32xf32> to vector<1x8x32xf32>
    tpu.vector_store %arg7[%c0_12, %c0_13, %c0_14], %18 {strides = array<i32>} : memref<1x8x32xf32, #tpu.memory_space<vmem>>, vector<1x8x32xf32>,
    return
  }
  func.func @transform_0(%arg0: i32, %arg1: i32) -> (i32, i32, i32) {
    %c0_i32 = arith.constant 0 : i32
    %c0_i32_0 = arith.constant 0 : i32
    return %arg0, %c0_i32, %arg1 : i32, i32, i32
  }
  func.func @transform_1(%arg0: i32, %arg1: i32) -> (i32, i32) {
    %c0_i32 = arith.constant 0 : i32
    %c0_i32_0 = arith.constant 0 : i32
    %c0_i32_1 = arith.constant 0 : i32
    return %c0_i32, %c0_i32_0 : i32, i32
  }
  func.func @transform_2(%arg0: i32, %arg1: i32) -> (i32, i32) {
    %c0_i32 = arith.constant 0 : i32
    %c0_i32_0 = arith.constant 0 : i32
    %c0_i32_1 = arith.constant 0 : i32
    return %c0_i32, %c0_i32_0 : i32, i32
  }
  func.func @transform_3(%arg0: i32, %arg1: i32) -> (i32, i32) {
    %c0_i32 = arith.constant 0 : i32
    %c0_i32_0 = arith.constant 0 : i32
    %c0_i32_1 = arith.constant 0 : i32
    return %c0_i32, %c0_i32_0 : i32, i32
  }
  func.func @transform_4(%arg0: i32, %arg1: i32) -> (i32, i32) {
    %c0_i32 = arith.constant 0 : i32
    %c0_i32_0 = arith.constant 0 : i32
    %c0_i32_1 = arith.constant 0 : i32
    return %c0_i32, %c0_i32_0 : i32, i32
  }
  func.func @transform_5(%arg0: i32, %arg1: i32) -> (i32, i32, i32) {
    %c0_i32 = arith.constant 0 : i32
    %c0_i32_0 = arith.constant 0 : i32
    return %arg0, %arg1, %c0_i32 : i32, i32, i32
  }
}

</mosaic_0001>

<bundles_post_ra>
// kernel: tpu_custom_call.1
= control target key start
LH: loop header
LB: loop body
LE: loop exit
PB: predicated region body
PF: predicated region fallthrough
CT: control target
= control target key end

     0   :  { %10 = vsyncpa [#allocation3], 0  ;;  %s1406_s0 = inlined_call_operand.vmem [shape: f32[2,32,8], index: 0, kind: input, shape index: {}]   ;;  %s1407_s1 = inlined_call_operand.vmem [shape: bf16[32,512], index: 1, kind: input, shape index: {}]   ;;  %s1408_s2 = inlined_call_operand.vmem [shape: f32[1,512], index: 2, kind: input, shape index: {}]   ;;  %s1409_s3 = inlined_call_operand.vmem [shape: bf16[512,32], index: 3, kind: input, shape index: {}]   ;;  %s1410_s4 = inlined_call_operand.vmem [shape: f32[1,32], index: 4, kind: input, shape index: {}]   ;;  %s1411_s5 = inlined_call_operand.hbm [shape: f32[2,8,32], index: 5, kind: output, shape index: {}]  }
   0x1   :  { %12 = vsyncpa [#allocation3 + $0x1], 0  ;;  %s1178_s18 = smov 0   ;;  %s1180_s19 = smov 0  }
   0x2   :  { %s1182_s20 = smov 0   ;;  %s1184_s21 = smov 0  }
   0x3   :  { %s1186_s22 = smov 0   ;;  %s1188_s23 = smov 0  }
   0x4 LB: > { %s868_s24 = sadd.s32 4294967295, %s1144_s23   ;;  %s869_s25 = sadd.s32 4294967294, %s1144_s23   ;;  %s1144_s23 = sphi %s1188_s23, %s18_s23   ;;  %s1140_s22 = sphi %s1186_s22, %s1418_s22   ;;  %s1136_s21 = sphi %s1184_s21, %s1417_s21   ;;  %s1132_s20 = sphi %s1182_s20, %s1416_s20   ;;  %s1128_s19 = sphi %s1180_s19, %s1415_s19   ;;  %s1124_s18 = sphi %s1178_s18, %s1414_s18  }
   0x5   : > { %s30_s26 = sadd.s32 1, %s1140_s22  ;;  %s151_s27 = sadd.s32 1, %s1132_s20 }
   0x6   : > { %p32_p0 = scmp.ge.s32.totalorder %s30_s26, 2  ;;  %p161_p1 = scmp.ne.s32.totalorder %s1132_s20, %s1128_s19 }
   0x7   : > { %p162_p2 = scmp.eq.s32.totalorder %s868_s24, 1  ;;  %p167_p3 = scmp.ne.s32.totalorder %s1128_s19, %s1124_s18 }
   0x8   : > { %s1420_s26 = smov (%p32_p0, %s30_s26), 0  ;;  %p168_p5 = scmp.eq.s32.totalorder %s869_s25, 1 }
   0x9   : > { %p1218_p4 = por %p162_p2, %p161_p1  ;;  %s146_s29 = ssub.s32 %s1140_s22, %s1420_s26 }
   0xa   : > { %p872_p6 = scmp.ge.s32.totalorder %s1144_s23, 1  ;;  %p149_p7 = scmp.eq.s32.totalorder %s146_s29, 0 }
   0xb   : > { %p1225_p8 = por %p168_p5, %p167_p3  ;;  %p209_p9 = scmp.lt.s32.totalorder %s1144_s23, 3 }
   0xc   : > { %s1231_s6 = scalar_select %p149_p7, %s1132_s20, %s151_s27  }
   0xd   : > { %p210_p10 = pnand %p872_p6, %p209_p9 }
   0xe   : > { %p240_p11 = scmp.lt.s32.totalorder (!%p210_p10), %s1136_s21, 1  ;;  %s237_s25 = sand.u32 (!%p210_p10), 1, %s1128_s19  }
   0xf   : > { %213 = sbr.rel (%p210_p10) target bundleno = 543 (0x21f), region = 40  ;;  %s873_s27 = sshll.u32 (!%p210_p10), %s237_s25, 3 }
  0x10   : > { %s920_s8 = sshll.u32 (!%p210_p10), %s1136_s21, 7  ;;  %s239_s9 = scalar_lea.vmem (!%p210_p10), [#allocation2], %s873_s27 }
  0x11   : > { %s780_s14 = scalar_lea.sflag (!%p210_p10), [#allocation3], %s237_s25 }
  0x14   : > { %v1024_v0 = vld [vmem:[%s1407_s1 + $0x24] ss:$16 sps:$4 sm:$0xff]   ;;  %v1026_v1 = vld [vmem:[%s1407_s1 + $0x2c] ss:$16 sps:$4 sm:$0xff]   ;;  %v1146_v2 = vmov 0   ;;  %s241_s11 = scalar_select %p240_p11, %s1136_s21, 1  ;;  %v265_v48 = vlaneseq }
  0x15   : > { %377 = vmatprep.mubr.bf16.mxu0 %v1146_v2  ;;  %418 = vmatprep.mubr.bf16.mxu1 %v1146_v2  ;;  %v1028_v3 = vld [vmem:[%s1407_s1 + $0x20] ss:$16 sps:$4 sm:$0xff]   ;;  %v1029_v4 = vld [vmem:[%s1407_s1 + $0x28] ss:$16 sps:$4 sm:$0xff]   ;;  %v1030_v5 = vld [vmem:[%s1407_s1 + $0x4] ss:$16 sps:$4 sm:$0xff]  }
  0x16   : > { %357 = vmatprep.subr.bf16.mxu0 %v1024_v0  ;;  %398 = vmatprep.subr.bf16.mxu1 %v1026_v1  ;;  %s923_s24 = sshll.u32 %s241_s11, 5  ;;  %v1032_v6 = vld [vmem:[%s1407_s1 + $0xc] ss:$16 sps:$4 sm:$0xff]   ;;  %v1034_v7 = vld [vmem:[%s1407_s1] ss:$16 sps:$4 sm:$0xff]   ;;  %vm341_vm0 = vcmask 261120   ;;  %s792_s11 = scalar_lea.hbm %s1411_s5, %s920_s8 }
  0x17   : > { %358 = vmatpush1.bf16.msra.mxu0 %v1028_v3  ;;  %399 = vmatpush1.bf16.msra.mxu1 %v1029_v4  ;;  %s247_s10 = scalar_lea.vmem %s1406_s0, %s923_s24  ;;  %v1035_v8 = vld [vmem:[%s1407_s1 + $0x8] ss:$16 sps:$4 sm:$0xff]   ;;  %v1040_v19 = vld [vmem:[%s1409_s3 + $0x70] sm:$0xff]   ;;  %v1048_v28 = vld [vmem:[%s1409_s3 + $0x60] sm:$0xff]   ;;  %v266_v49 = vshrl.u32 %v265_v48, 7  ;;  %s1147_s21 = smov [#allocation2]  }
  0x18   : > { %359 = vmatprep.subr.bf16.mxu0 %v1030_v5  ;;  %v249_v9 = vld [vmem:[%s247_s10] sm:$0xff]  ;;  %v250_v10 = vld [vmem:[%s247_s10 + $0x8] sm:$0xff]  ;;  %v251_v11 = vld [vmem:[%s247_s10 + $0x10] sm:$0xff]  ;;  %400 = vmatprep.subr.bf16.mxu1 %v1032_v6  ;;  %s1072_s16 = sshll.u32 %s1147_s21, 4  ;;  %s1073_s16 = int_to_ptr.vmem [resolvable:$false] %s1072_s16 }
  0x19   : > { %v253_v12 = vpack.c.bf16 %v250_v10, %v249_v9  ;;  %v252_v13 = vld [vmem:[%s247_s10 + $0x18] sm:$0xff]  ;;  %v1041_v20 = vld [vmem:[%s1409_s3 + $0xf0] sm:$0xff]   ;;  %v1044_v24 = vld [vmem:[%s1409_s3 + $0x68] sm:$0xff]   ;;  %v267_v50 = vsub.s32 0, %v266_v49  ;;  %v275_v51 = vsub.s32 2, %v266_v49  ;;  %v271_v53 = vsub.s32 1, %v266_v49 }
  0x1a   : > { %v1036_v14 = vld [vmem:[%s1409_s3 + $0x78] sm:$0xff]   ;;  %v254_v16 = vpack.c.bf16 %v252_v13, %v251_v11  ;;  %v1042_v22 = vld [vmem:[%s1409_s3 + $0x30] sm:$0xff]   ;;  %v1045_v25 = vld [vmem:[%s1409_s3 + $0xe8] sm:$0xff]   ;;  %v279_v54 = vsub.s32 3, %v266_v49  ;;  %s794_s10 = sshll.u32 %s239_s9, 4  ;;  %s1074_s17 = scalar_lea.vmem %s1073_s16, 256  ;;  %s795_s10 = int_to_ptr.vmem [resolvable:$true] %s794_s10 }
  0x1b   : > { %360 = vmatpush1.bf16.msra.mxu0 %v1034_v7  ;;  %401 = vmatpush1.bf16.msra.mxu1 %v1035_v8  ;;  %v1037_v15 = vld [vmem:[%s1409_s3 + $0xf8] sm:$0xff]   ;;  %v1043_v23 = vld [vmem:[%s1409_s3 + $0xb0] sm:$0xff]   ;;  %v1046_v26 = vld [vmem:[%s1409_s3 + $0x28] sm:$0xff]   ;;  %s1068_s15 = scalar_lea.vmem %s795_s10, 128  ;;  %p1075_p1 = scmp.lt.s32.totalorder %s795_s10, %s1073_s16 }
  0x1c   : > { %285 = vxpose.xlu0.c.b16.start [1/2] (short) (narrow) %v253_v12, 16  ;;  %924 = vmatprep.subr.bf16.mxu0 %v1036_v14  ;;  %v1038_v17 = vld [vmem:[%s1409_s3 + $0x38] sm:$0xff]   ;;  %v1047_v27 = vld [vmem:[%s1409_s3 + $0xa8] sm:$0xff]   ;;  %v1049_v29 = vld [vmem:[%s1409_s3 + $0xe0] sm:$0xff]   ;;  %p1069_p12 = scmp.ne.s32.totalorder %s795_s10, %s1068_s15  ;;  %p1076_p2 = scmp.lt.s32.totalorder %s1074_s17, %s1068_s15 }
  0x1d   : > { %946 = vmatprep.subr.bf16.mxu1 %v1037_v15  ;;  %v1039_v18 = vld [vmem:[%s1409_s3 + $0xb8] sm:$0xff]   ;;  %v1050_v30 = vld [vmem:[%s1409_s3 + $0x20] sm:$0xff]   ;;  %v1056_v36 = vld [vmem:[%s1409_s3 + $0x50] sm:$0xff]  }
  0x1e   : > { %v1051_v31 = vld [vmem:[%s1409_s3 + $0xa0] sm:$0xff]   ;;  %v1052_v32 = vld [vmem:[%s1409_s3 + $0x58] sm:$0xff]   ;;  %v1057_v37 = vld [vmem:[%s1409_s3 + $0xd0] sm:$0xff]   ;;  %p1070_p13 = pnand %p1069_p12, %p1218_p4  ;;  %p1077_p3 = por %p1076_p2, %p1075_p1 }
  0x1f   : > { %v1053_v33 = vld [vmem:[%s1409_s3 + $0xd8] sm:$0xff]   ;;  %v1058_v38 = vld [vmem:[%s1409_s3 + $0x10] sm:$0xff]   ;;  %v1060_v40 = vld [vmem:[%s1409_s3 + $0x48] sm:$0xff]  }
  0x20   : > { %286 = vxpose.xlu0.c.b16.end [2/2] (short) (narrow) %v254_v16, 16  ;;  %v1054_v34 = vld [vmem:[%s1409_s3 + $0x18] sm:$0xff]   ;;  %v1059_v39 = vld [vmem:[%s1409_s3 + $0x90] sm:$0xff]   ;;  %v1061_v41 = vld [vmem:[%s1409_s3 + $0xc8] sm:$0xff]   ;;  %p1071_p0 = pneg %p1070_p13 }
  0x21   : > { %v1055_v35 = vld [vmem:[%s1409_s3 + $0x98] sm:$0xff]   ;;  %v1062_v42 = vld [vmem:[%s1409_s3 + $0x8] sm:$0xff]   ;;  %v1064_v44 = vld [vmem:[%s1409_s3 + $0x40] sm:$0xff]  }
  0x22   : > { %v1063_v43 = vld [vmem:[%s1409_s3 + $0x88] sm:$0xff]   ;;  %v1065_v45 = vld [vmem:[%s1409_s3 + $0xc0] sm:$0xff]   ;;  %p1078_p5 = pnand %p1077_p3, %p1071_p0 }
  0x23   : > { %v1066_v46 = vld [vmem:[%s1409_s3] sm:$0xff]  }
  0x24   : > { %v1067_v47 = vld [vmem:[%s1409_s3 + $0x80] sm:$0xff]  }
  0x25   : > { %v263_v52 = vld [vmem:[%s1408_s2] sm:$0xf] }
  0x26   : > { %v268_v55 = vrot.slane %v263_v52, %v267_v50  ;;  %v276_v56 = vrot.slane %v263_v52, %v275_v51  ;;  %v272_v57 = vrot.slane %v263_v52, %v271_v53  ;;  %v280_v58 = vrot.slane %v263_v52, %v279_v54 }
  0x7e   : > { %v293_v21 = vpop.trf.xlu0 }
  0x7f   : > { %884 = vmatmul.mubr.msk.bf16.vlgmr.msra.gmra.mxu0 %vm341_vm0, %v293_v21  ;;  %885 = vmatmul.mubr.msk.bf16.vlgmr.msra.gmra.mxu1 %vm341_vm0, %v293_v21 }
  0x80   : > { %925 = vmatpush3.bf16.msra.mxu0 %v1038_v17  ;;  %947 = vmatpush3.bf16.msra.mxu1 %v1039_v18  ;;  %v886_v17 = vld [vmem:[%s1410_s4] ss:$0 sm:$0xff] }
  0x81   : > { %926 = vmatprep.subr.bf16.mxu0 %v1040_v19  ;;  %948 = vmatprep.subr.bf16.mxu1 %v1041_v20 }
  0x84   : > { %927 = vmatpush3.bf16.msra.mxu0 %v1042_v22  ;;  %949 = vmatpush3.bf16.msra.mxu1 %v1043_v23 }
  0x85   : > { %928 = vmatprep.subr.bf16.mxu0 %v1044_v24  ;;  %950 = vmatprep.subr.bf16.mxu1 %v1045_v25 }
  0x88   : > { %929 = vmatpush3.bf16.msra.mxu0 %v1046_v26  ;;  %951 = vmatpush3.bf16.msra.mxu1 %v1047_v27 }
  0x89   : > { %930 = vmatprep.subr.bf16.mxu0 %v1048_v28  ;;  %952 = vmatprep.subr.bf16.mxu1 %v1049_v29 }
  0x8c   : > { %931 = vmatpush3.bf16.msra.mxu0 %v1050_v30  ;;  %953 = vmatpush3.bf16.msra.mxu1 %v1051_v31 }
  0x8d   : > { %932 = vmatprep.subr.bf16.mxu0 %v1052_v32  ;;  %954 = vmatprep.subr.bf16.mxu1 %v1053_v33 }
  0x90   : > { %933 = vmatpush3.bf16.msra.mxu0 %v1054_v34  ;;  %955 = vmatpush3.bf16.msra.mxu1 %v1055_v35 }
  0x91   : > { %934 = vmatprep.subr.bf16.mxu0 %v1056_v36  ;;  %956 = vmatprep.subr.bf16.mxu1 %v1057_v37 }
  0x94   : > { %935 = vmatpush3.bf16.msra.mxu0 %v1058_v38  ;;  %957 = vmatpush3.bf16.msra.mxu1 %v1059_v39 }
  0x95   : > { %936 = vmatprep.subr.bf16.mxu0 %v1060_v40  ;;  %958 = vmatprep.subr.bf16.mxu1 %v1061_v41 }
  0x98   : > { %937 = vmatpush3.bf16.msra.mxu0 %v1062_v42  ;;  %959 = vmatpush3.bf16.msra.mxu1 %v1063_v43 }
  0x99   : > { %938 = vmatprep.subr.bf16.mxu0 %v1064_v44  ;;  %960 = vmatprep.subr.bf16.mxu1 %v1065_v45 }
  0x9c   : > { %939 = vmatpush3.bf16.msra.mxu0 %v1066_v46  ;;  %961 = vmatpush3.bf16.msra.mxu1 %v1067_v47 }
 0x13f   : > { %v379_v59 = vpop.f32.mrf.mxu0  ;;  %v420_v60 = vpop.f32.mrf.mxu1 }
 0x140   : > { %v380_v61 = vadd.f32 %v379_v59, %v268_v55  ;;  %v421_v62 = vadd.f32 %v420_v60, %v276_v56 }
 0x141   : > { %v381_v63 = vpop.f32.mrf.mxu0  ;;  %v422_v0 = vpop.f32.mrf.mxu1 }
 0x142   : > { %v382_v1 = vadd.f32 %v381_v63, %v272_v57  ;;  %v423_v2 = vadd.f32 %v422_v0, %v280_v58  ;;  %v427_v3 = vmax.f32 %v380_v61, 0.0  ;;  %v429_v4 = vmax.f32 %v421_v62, 0.0 }
 0x143   : > { %v383_v5 = vpop.f32.mrf.mxu0  ;;  %v424_v6 = vpop.f32.mrf.mxu1 }
 0x144   : > { %v428_v7 = vmax.f32 %v382_v1, 0.0  ;;  %v430_v8 = vmax.f32 %v423_v2, 0.0  ;;  %v431_v13 = vpack.c.bf16 %v427_v3, %v427_v3  ;;  %v433_v14 = vpack.c.bf16 %v429_v4, %v429_v4 }
 0x145   : > { %v384_v9 = vpop.f32.mrf.mxu0  ;;  %v425_v10 = vpop.f32.mrf.mxu1 }
 0x146   : > { %v432_v11 = vpack.c.bf16 %v428_v7, %v428_v7  ;;  %v434_v12 = vpack.c.bf16 %v430_v8, %v430_v8 }
 0x148   : > { %730 = vmatprep.mubr.bf16.mxu0 %v432_v11  ;;  %770 = vmatprep.mubr.bf16.mxu1 %v434_v12 }
 0x149   : > { %731 = vmatmul.mubr.bf16.vlgmr.msra.gmra.mxu0 %v431_v13  ;;  %771 = vmatmul.mubr.bf16.vlgmr.msra.gmra.mxu1 %v433_v14 }
 0x209   : > { %v940_v15 = vpop.f32.mrf.mxu0  ;;  %v962_v16 = vpop.f32.mrf.mxu1 }
 0x20b   : > { %v941_v18 = vpop.f32.mrf.mxu0  ;;  %v963_v19 = vpop.f32.mrf.mxu1 }
 0x20c   : > { %v942_v20 = vadd.f32 %v941_v18, %v940_v15  ;;  %v964_v24 = vadd.f32 %v963_v19, %v962_v16 }
 0x20d   : > { %v943_v21 = vpop.f32.mrf.mxu0  ;;  %v965_v22 = vpop.f32.mrf.mxu1 }
 0x20e   : > { %v733_v23 = vadd.f32 %v942_v20, %v886_v17 }
 0x20f   : > { %v944_v25 = vpop.f32.mrf.mxu0  ;;  %v966_v26 = vpop.f32.mrf.mxu1 }
 0x210   : > { %v773_v27 = vadd.f32 %v964_v24, %v733_v23 }
 0x212   : > { %778 = vst.msk [vmem:[%s239_s9] sm:$0xff] %vm341_vm0, %v773_v27 }
 0x213   : > { %1081 = shalt.err (!%p1078_p5)
}
 0x214   : > { %s1082_s24 = scalar_lea.hbm %s792_s11, 128  ;;  %s1086_s29 = scalar_lea.hbm %s1411_s5, 256 }
 0x215   : > { %p1083_p6 = scmp.ne.s32.totalorder %s792_s11, %s1082_s24  ;;  %p1087_p10 = scmp.lt.s32.totalorder %s792_s11, %s1411_s5 }
 0x216   : > { %p1088_p11 = scmp.lt.s32.totalorder %s1086_s29, %s1082_s24 }
 0x217   : > { %p1084_p7 = pnand %p1083_p6, %p1218_p4 }
 0x218   : > { %p1089_p12 = por %p1088_p11, %p1087_p10 }
 0x219   : > { %p1085_p9 = pneg %p1084_p7 }
 0x21b   : > { %p1090_p13 = pnand %p1089_p12, %p1085_p9 }
 0x21d   : > { %1093 = shalt.err (!%p1090_p13)
}
 0x21e   : > { %968 = dma.vmem_to_hbm [thread:$0]  (%p1218_p4), %s795_s10, 128, %s792_s11, %s780_s14  }
 0x21f PF: > { %p974_p0 = scmp.ge.s32.totalorder %s1144_s23, 2  ;;  %s806_s9 = sand.u32 1, %s1124_s18  }
 0x220   : > { %s807_s12 = scalar_lea.sflag [#allocation3], %s806_s9 }
 0x221   : > { %p971_p1 = pnand %p974_p0, %p1225_p8 }
 0x223   : > { %p972_p2 = pneg %p971_p1 }
 0x225   : > { %1119 = dma.done.wait (%p972_p2), %s807_s12, 128  }
 0x226   : > { %1121 = vsyncadd (%p972_p2), %s807_s12, 4294967168  ;;  %s18_s23 = sadd.s32 1, %s1144_s23   ;;  %s1414_s18 = smov %s1128_s19 }
 0x227   : > { %p15_p3 = scmp.ge.s32.totalorder %s18_s23, 4   ;;  %s1415_s19 = smov %s1132_s20 }
 0x228   : > { %s1416_s20 = smov %s1231_s6  ;;  %s1417_s21 = smov %s1140_s22 }
 0x229   : > { %s1418_s22 = smov %s1420_s26  ;;  %17 = sbr.rel (!%p15_p3) target bundleno = 4 (0x4), region = 75 }
 0x22e   :  { %812 = vsyncpa [#allocation3], 1 }
 0x22f   :  { %814 = vsyncpa [#allocation3 + $0x1], 1 }

</bundles_post_ra>
